<compile_context>
chip_gen: v5e
topology: v5e:2x2
jax: 0.10.0
libtpu: 0.0.40
codegen_flags: <defaults>
</compile_context>

<pallas_src>
import numpy as np
import jax
import jax.numpy as jnp
from jax import lax
from jax.experimental import pallas as pl
from jax.experimental.pallas import tpu as pltpu

NEG_INF = -1e30


def _round_up(x, m):
    return ((x + m - 1) // m) * m


def _choose_tile(bn):
    """Row-tile size / padded row count.  Tiles are multiples of 8 (sublane) and, when
    more than one tile is used, multiples of 128 so the (1, TILE) output row stays a
    legal lane-dense block.  256 rows keeps the per-tile score slab small enough for
    v7x's 64 MiB VMEM while still amortizing the ~0.35 us/step grid overhead."""
    if bn <= 256:
        tile = _round_up(bn, 8)
        return tile, tile
    return 256, _round_up(bn, 256)


# ---------------------------------------------------------------------------
# Kernel 1: GraphLayer.lin  (x_flat @ W_lin), row-tiled.
# ---------------------------------------------------------------------------
def proj_kernel(x_ref, w_ref, out_ref):
    out_ref[...] = jnp.dot(x_ref[...].astype(jnp.bfloat16),
                           w_ref[...].astype(jnp.bfloat16),
                           preferred_element_type=jnp.float32)


def proj_pallas(x_p, w_lin, tile):
    bn_pad, t = x_p.shape
    d = w_lin.shape[1]
    return pl.pallas_call(
        proj_kernel,
        out_shape=jax.ShapeDtypeStruct((bn_pad, d), jnp.float32),
        grid=(bn_pad // tile,),
        in_specs=[pl.BlockSpec((tile, t), lambda i: (i, 0)),
                  pl.BlockSpec((t, d), lambda i: (0, 0))],
        out_specs=pl.BlockSpec((tile, d), lambda i: (i, 0)),
        compiler_params=pltpu.CompilerParams(dimension_semantics=("parallel",)),
    )(x_p, w_lin)


# ---------------------------------------------------------------------------
# Kernel 2: graph attention + aggregation + GNNLayer BN/ReLU + full output head.
# One grid step handles one tile of target rows; sources span all BN_pad rows.
# ---------------------------------------------------------------------------
def attn_head_kernel(idx_ref, xlin_t_ref, emb_t_ref, xlin_f_ref, emb_f_ref, att_ref,
                     scale1_ref, shift1_ref, bn2s_ref, bn2b_ref,
                     w1_ref, b1_ref, w2_ref, headc_ref, out_ref):
    dn = (((1,), (1,)), ((), ()))          # contract trailing axis of both operands
    f32, bf16 = jnp.float32, jnp.bfloat16

    att = att_ref[...].astype(bf16)        # (4, D): [att_i, att_em_i, att_j, att_em_j]
    xlin_t = xlin_t_ref[...].astype(bf16)  # (TILE, D)   target rows of this tile
    emb_t_f32 = emb_t_ref[...]             # (TILE, D)   f32 copy for the elementwise path
    emb_t = emb_t_f32.astype(bf16)
    xlin_f = xlin_f_ref[...].astype(bf16)  # (BN_pad, D) all source rows (values + scores)
    emb_f = emb_f_ref[...].astype(bf16)

    # ---- attention logits s[i, j] = a_i + b_j ---------------------------------
    # a (target term) for the tile rows; b (source term) for *all* rows produced
    # directly as a (1, BN_pad) row -> no transpose / sublane relayout anywhere.
    sx_t = lax.dot_general(xlin_t, att, dn, preferred_element_type=f32)   # (TILE, 4)
    se_t = lax.dot_general(emb_t, att, dn, preferred_element_type=f32)    # (TILE, 4)
    a_col = sx_t[:, 0:1] + se_t[:, 1:2]                                   # (TILE, 1)
    sx_f = lax.dot_general(att, xlin_f, dn, preferred_element_type=f32)   # (4, BN_pad)
    se_f = lax.dot_general(att, emb_f, dn, preferred_element_type=f32)    # (4, BN_pad)
    b_row = sx_f[2:3, :] + se_f[3:4, :]                                   # (1, BN_pad)

    s = a_col + b_row                                   # (TILE, BN_pad)
    s = jnp.where(s >= 0, s, 0.2 * s)                   # leaky_relu(0.2)

    # ---- sparsity mask rebuilt from per-target neighbour indices ---------------
    idx = idx_ref[...]                                  # (TILE, K1) int32, -1 = padding
    cols = lax.broadcasted_iota(jnp.int32, s.shape, 1)
    allowed = cols == idx[:, 0:1]
    for k in range(1, idx.shape[1]):                    # K1 = topk+1 is tiny -> unrolled
        allowed = jnp.logical_or(allowed, cols == idx[:, k:k + 1])
    s = jnp.where(allowed, s, NEG_INF)

    # ---- per-target softmax with deferred normalization ------------------------
    m = jnp.max(s, axis=-1, keepdims=True)
    p = jnp.exp(s - m)                                  # masked entries underflow to 0
    denom = jnp.sum(p, axis=-1, keepdims=True)          # self-loop => > 0 for real rows
    ctx = jnp.dot(p.astype(bf16), xlin_f, preferred_element_type=f32)     # (TILE, D)
    ctx = ctx * pl.reciprocal(denom, approx=True)       # normalize after matmul (EUP)

    # ---- GraphLayer bias + GNNLayer BatchNorm(eval) + ReLU (folded affine) -----
    g = jnp.maximum(ctx * scale1_ref[...] + shift1_ref[...], 0.0)
    # ---- GDN head: * embedding, bn_outlayer_in(eval)+ReLU, dropout(eval)=id ----
    g = g * emb_t_f32
    g = jnp.maximum(g * bn2s_ref[...] + bn2b_ref[...], 0.0)
    # ---- OutLayer: Linear(D,H) -> Linear(H,1) -> BatchNorm1d(1)(eval) -> ReLU --
    h = jnp.dot(g.astype(bf16), w1_ref[...].astype(bf16),
                preferred_element_type=f32) + b1_ref[...]                 # (TILE, H)
    # Linear(H,1) emitted as a (1,H)x(TILE,H)^T dot so the result is already a
    # lane-dense (1, TILE) row: no width-1 masked store, no sublane->lane relayout.
    y = lax.dot_general(w2_ref[...].astype(bf16), h.astype(bf16), dn,
                        preferred_element_type=f32)                       # (1, TILE)
    c = headc_ref[...]                                  # (1, 4) = [b2, bn3_s, bn3_b, 0]
    y = (y + c[:, 0:1]) * c[:, 1:2] + c[:, 2:3]
    out_ref[...] = jnp.maximum(y, 0.0)


def attn_head_pallas(idx_p, xlin, emb_p, att, scale1, shift1, bn2_s, bn2_b,
                     w1, b1, w2_row, head_c, tile):
    bn_pad, d = xlin.shape
    k1 = idx_p.shape[1]
    h = w1.shape[1]

    def row_tiled(last):
        return pl.BlockSpec((tile, last), lambda i: (i, 0))

    def const(shp):
        return pl.BlockSpec(shp, lambda i: tuple(0 for _ in shp))

    # VMEM budget: double-buffered per-tile blocks + resident full tensors + the
    # (tile, BN_pad) score/prob temporaries.  Clamped to leave headroom on v7x (64 MiB).
    resident = 4 * (2 * bn_pad * d + 12 * d + d * h + 3 * h + 8)
    per_tile = 2 * 4 * (tile * (k1 + 2 * d) + tile)
    temps = 4 * 4 * tile * bn_pad
    vmem_limit = int(min(48 << 20, max(8 << 20, 2 * (resident + per_tile + temps))))

    return pl.pallas_call(
        attn_head_kernel,
        out_shape=jax.ShapeDtypeStruct((1, bn_pad), jnp.float32),
        grid=(bn_pad // tile,),
        in_specs=[row_tiled(k1),                 # neighbour indices (this tile's targets)
                  row_tiled(d),                  # x_lin, target rows
                  row_tiled(d),                  # embedding, target rows
                  const((bn_pad, d)),            # x_lin, all source rows (resident)
                  const((bn_pad, d)),            # embedding, all source rows (resident)
                  const((4, d)),                 # att_i / att_em_i / att_j / att_em_j
                  const((1, d)), const((1, d)),  # folded (bias + BN1) scale / shift
                  const((1, d)), const((1, d)),  # bn_outlayer_in scale / shift
                  const((d, h)), const((1, h)),  # Linear(D, H)
                  const((1, h)), const((1, 4))], # Linear(H, 1) row + [b2, bn3_s, bn3_b, 0]
        out_specs=pl.BlockSpec((1, tile), lambda i: (0, i)),   # lane-dense output row
        compiler_params=pltpu.CompilerParams(dimension_semantics=("parallel",),
                                             vmem_limit_bytes=vmem_limit),
    )(idx_p, xlin, emb_p, xlin, emb_p, att, scale1, shift1, bn2_s, bn2_b,
      w1, b1, w2_row, head_c)


# ---------------------------------------------------------------------------
# Host glue: graph construction + parameter setup + forward
# ---------------------------------------------------------------------------
def build_neighbor_indices(emb_np, topk, batch):
    """Cosine top-k KNN graph (fallback_knn_graph semantics), batched with per-batch
    node offsets; self loops removed then re-added (GraphLayer.forward).  Returns a
    (B*N, topk+1) int32 array of source indices per target row, padded with -1."""
    n = emb_np.shape[0]
    norms = np.linalg.norm(emb_np, axis=-1, keepdims=True)
    cos = (emb_np @ emb_np.T) / (norms @ norms.T)
    topk_j = np.argsort(-cos, axis=-1)[:, :topk]
    k1 = topk + 1
    idx = np.full((batch * n, k1), -1, np.int32)
    for b in range(batch):
        off = b * n
        for i in range(n):
            srcs = [off + j for j in topk_j[i] if j != i]   # remove_self_loops
            srcs.append(off + i)                            # add_self_loops
            idx[off + i, :len(srcs)] = srcs
    return idx


def mask_from_indices(idx_np, bn):
    """Dense mask (for the pure-JAX reference only)."""
    mask = np.zeros((bn, bn), np.float32)
    rows = np.repeat(np.arange(bn), idx_np.shape[1])
    cols = idx_np.reshape(-1)
    valid = cols >= 0
    mask[rows[valid], cols[valid]] = 1.0
    return mask


def init_params(key, n, t, d, h):
    ks = jax.random.split(key, 11)
    p = {}
    p["emb"] = jax.random.uniform(ks[0], (n, d), jnp.float32, -0.5, 0.5)      # nn.Embedding
    p["w_lin"] = jax.random.normal(ks[1], (t, d), jnp.float32) / np.sqrt(t)   # GraphLayer.lin.weight^T
    p["att"] = jax.random.normal(ks[2], (4, d), jnp.float32) * 0.2            # att_i, att_em_i, att_j, att_em_j
    p["gnn_bias"] = 0.1 * jax.random.normal(ks[3], (1, d), jnp.float32)       # GraphLayer.bias

    def bn_fold(k, c):  # BatchNorm eval: y = (x - rm)/sqrt(rv+eps)*gamma + beta -> scale/bias
        k1, k2, k3, k4 = jax.random.split(k, 4)
        gamma = 1.0 + 0.1 * jax.random.normal(k1, (1, c), jnp.float32)
        beta = 0.1 * jax.random.normal(k2, (1, c), jnp.float32)
        rm = 0.1 * jax.random.normal(k3, (1, c), jnp.float32)
        rv = 1.0 + 0.1 * jax.random.uniform(k4, (1, c), jnp.float32)
        scale = gamma / jnp.sqrt(rv + 1e-5)
        bias = beta - rm * scale
        return scale, bias

    p["bn1_s"], p["bn1_b"] = bn_fold(ks[4], d)    # GNNLayer.bn
    p["bn2_s"], p["bn2_b"] = bn_fold(ks[5], d)    # GDN.bn_outlayer_in
    bn3_s, bn3_b = bn_fold(ks[6], 1)              # OutLayer BatchNorm1d(1)
    p["bn3"] = jnp.concatenate([bn3_s, bn3_b], axis=1)                        # (1, 2)
    p["w1"] = jax.random.normal(ks[7], (d, h), jnp.float32) / np.sqrt(d)      # OutLayer Linear(dim, 64)
    p["b1"] = 0.1 * jax.random.normal(ks[8], (1, h), jnp.float32)
    p["w2"] = jax.random.normal(ks[9], (h, 1), jnp.float32) / np.sqrt(h)      # OutLayer Linear(64, 1)
    p["b2"] = 0.1 * jax.random.normal(ks[10], (1, 1), jnp.float32)
    return p


def gdn_forward(x, params, idx):
    # x: (B, T, N) — same layout as the PyTorch module's `inputs`
    b, t, n = x.shape
    bn = b * n
    d = params["w_lin"].shape[1]
    h = params["w1"].shape[1]
    tile, bn_pad = _choose_tile(bn)
    pad = bn_pad - bn

    x_flat = jnp.transpose(x, (0, 2, 1)).reshape(bn, t)        # x.transpose(1,2).reshape(-1, T)
    emb_bn = jnp.tile(params["emb"], (b, 1))                   # all_embeddings.repeat(batch_num, 1)
    # NOTE: the (BN, D) embedding replication is kept on the host; it is O(BN*D) and
    # negligible next to the eliminated O(BN^2) mask stream.
    x_p = jnp.pad(x_flat, ((0, pad), (0, 0)))
    emb_p = jnp.pad(emb_bn, ((0, pad), (0, 0)))
    idx_p = jnp.pad(idx, ((0, pad), (0, 0)), constant_values=-1)

    xlin = proj_pallas(x_p, params["w_lin"], tile)             # (BN_pad, D)

    # exact algebraic folds (f32, host side): GraphLayer bias + BN1 -> scale/shift,
    # Linear(H,1) bias + BN3 handled via the packed head constants.
    scale1 = params["bn1_s"]
    shift1 = params["gnn_bias"] * params["bn1_s"] + params["bn1_b"]
    w2_row = params["w2"].reshape(1, h)
    head_c = jnp.concatenate(
        [params["b2"], params["bn3"][:, 0:1], params["bn3"][:, 1:2],
         jnp.zeros((1, 1), jnp.float32)], axis=1)              # (1, 4)

    y = attn_head_pallas(idx_p, xlin, emb_p, params["att"], scale1, shift1,
                         params["bn2_s"], params["bn2_b"], params["w1"], params["b1"],
                         w2_row, head_c, tile)                 # (1, BN_pad)
    return y[0, :bn].reshape(b, n)[:, None, :]                 # out.view(batch, 1, node_num)


def gdn_reference(x, params, mask):
    """Pure-JAX reference with the same numerics (bf16 MXU inputs, f32 accumulation,
    f32 element-wise math); mirrors the module's eval-mode forward."""
    b, t, n = x.shape
    bn = b * n
    f32, bf16 = jnp.float32, jnp.bfloat16
    x_flat = jnp.transpose(x, (0, 2, 1)).reshape(bn, t)
    emb_bn = jnp.tile(params["emb"], (b, 1))
    xlin = jnp.dot(x_flat.astype(bf16), params["w_lin"].astype(bf16),
                   preferred_element_type=f32)
    att = params["att"].astype(bf16)
    xlin_bf, emb_bf = xlin.astype(bf16), emb_bn.astype(bf16)
    a = (jnp.dot(xlin_bf, att[0], preferred_element_type=f32)
         + jnp.dot(emb_bf, att[1], preferred_element_type=f32))
    bb = (jnp.dot(xlin_bf, att[2], preferred_element_type=f32)
          + jnp.dot(emb_bf, att[3], preferred_element_type=f32))
    s = a[:, None] + bb[None, :]
    s = jnp.where(s >= 0, s, 0.2 * s)
    s = jnp.where(mask > 0, s, NEG_INF)
    p = jnp.exp(s - jnp.max(s, axis=-1, keepdims=True))
    denom = jnp.sum(p, axis=-1, keepdims=True)
    ctx = jnp.dot(p.astype(bf16), xlin_bf, preferred_element_type=f32) / denom
    g = jnp.maximum((ctx + params["gnn_bias"]) * params["bn1_s"] + params["bn1_b"], 0.0)
    g = g * emb_bn
    g = jnp.maximum(g * params["bn2_s"] + params["bn2_b"], 0.0)
    h = jnp.dot(g.astype(bf16), params["w1"].astype(bf16),
                preferred_element_type=f32) + params["b1"]
    y = jnp.dot(h.astype(bf16), params["w2"].astype(bf16),
                preferred_element_type=f32) + params["b2"]
    y = jnp.maximum(y * params["bn3"][:, 0:1] + params["bn3"][:, 1:2], 0.0)
    return y.reshape(b, n)[:, None, :]


if __name__ == "__main__":
    def run_case(b, n, t, d, h, topk, seed):
        key = jax.random.PRNGKey(seed)
        kx, kp = jax.random.split(key)
        x = jax.random.normal(kx, (b, t, n), jnp.float32)
        params = init_params(kp, n, t, d, h)
        idx = jnp.asarray(build_neighbor_indices(np.asarray(params["emb"]), topk, b))

        out = jax.block_until_ready(jax.jit(gdn_forward)(x, params, idx))
        assert out.shape == (b, 1, n)

        mask = jnp.asarray(mask_from_indices(np.asarray(idx), b * n))
        ref = gdn_reference(x, params, mask)
        # tolerance covers the EUP approximate reciprocal + MXU accumulation order
        np.testing.assert_allclose(np.asarray(out), np.asarray(ref), rtol=1e-2, atol=1e-2)

    # Small case per the module example (batch=2, window=16, node_num=8, dim=32, hidden=64).
    run_case(b=2, n=8, t=16, d=32, h=64, topk=4, seed=0)
    # Multi-tile case exercising the row-tiled pipeline (BN=320 -> 2 tiles of 256, padded).
    run_case(b=5, n=64, t=16, d=32, h=64, topk=8, seed=1)
    print("KERNEL_OK")
</pallas_src>

<mosaic_0001>
module attributes {stable_mosaic.version = 11 : i64} {
  func.func @proj_kernel(%arg0: i32, %arg1: memref<16x16xf32, #tpu.memory_space<vmem>>, %arg2: memref<16x32xf32, #tpu.memory_space<vmem>>, %arg3: memref<16x32xf32, #tpu.memory_space<vmem>>) attributes {dimension_semantics = [#tpu.dimension_semantics<parallel>], iteration_bounds = array<i64: 1>, scalar_prefetch = 0 : i64, scratch_operands = 0 : i64, tpu.core_type = #tpu.core_type<tc>, window_params = [{transform_indices = @transform_0, window_bounds = array<i64: 16, 16>}, {pipeline_mode = #tpu.pipeline_mode<synchronous>, transform_indices = @transform_1, window_bounds = array<i64: 16, 32>}, {transform_indices = @transform_2, window_bounds = array<i64: 16, 32>}]} {
    %c0 = arith.constant 0 : index
    %c0_0 = arith.constant 0 : index
    %0 = vector.load %arg1[%c0, %c0_0] : memref<16x16xf32, #tpu.memory_space<vmem>>, vector<16x16xf32>
    %1 = arith.truncf %0 : vector<16x16xf32> to vector<16x16xbf16>
    %c0_1 = arith.constant 0 : index
    %c0_2 = arith.constant 0 : index
    %2 = vector.load %arg2[%c0_1, %c0_2] : memref<16x32xf32, #tpu.memory_space<vmem>>, vector<16x32xf32>
    %3 = arith.truncf %2 : vector<16x32xf32> to vector<16x32xbf16>
    %cst = arith.constant dense<0.000000e+00> : vector<16x32xf32>
    %4 = tpu.matmul %1, %3, %cst {dimension_numbers = #tpu.dot_dimension_numbers<[1], [0], [0], [1], [0, 0, 1, 1], [], []>} : vector<16x16xbf16>, vector<16x32xbf16>, vector<16x32xf32> -> vector<16x32xf32>
    %c0_3 = arith.constant 0 : index
    %c0_4 = arith.constant 0 : index
    %5 = vector.load %arg3[%c0_3, %c0_4] : memref<16x32xf32, #tpu.memory_space<vmem>>, vector<16x32xf32>
    tpu.vector_store %arg3[%c0_3, %c0_4], %4 {strides = array<i32>} : memref<16x32xf32, #tpu.memory_space<vmem>>, vector<16x32xf32>,
    return
  }
  func.func @transform_0(%arg0: i32) -> (i32, i32) {
    %c0_i32 = arith.constant 0 : i32
    %c0_i32_0 = arith.constant 0 : i32
    return %arg0, %c0_i32 : i32, i32
  }
  func.func @transform_1(%arg0: i32) -> (i32, i32) {
    %c0_i32 = arith.constant 0 : i32
    %c0_i32_0 = arith.constant 0 : i32
    %c0_i32_1 = arith.constant 0 : i32
    return %c0_i32, %c0_i32_0 : i32, i32
  }
  func.func @transform_2(%arg0: i32) -> (i32, i32) {
    %c0_i32 = arith.constant 0 : i32
    %c0_i32_0 = arith.constant 0 : i32
    return %arg0, %c0_i32 : i32, i32
  }
}

module attributes {stable_mosaic.version = 11 : i64} {
  func.func @attn_head_kernel(%arg0: i32, %arg1: memref<16x5xi32, #tpu.memory_space<vmem>>, %arg2: memref<16x32xf32, #tpu.memory_space<vmem>>, %arg3: memref<16x32xf32, #tpu.memory_space<vmem>>, %arg4: memref<16x32xf32, #tpu.memory_space<vmem>>, %arg5: memref<16x32xf32, #tpu.memory_space<vmem>>, %arg6: memref<4x32xf32, #tpu.memory_space<vmem>>, %arg7: memref<1x32xf32, #tpu.memory_space<vmem>>, %arg8: memref<1x32xf32, #tpu.memory_space<vmem>>, %arg9: memref<1x32xf32, #tpu.memory_space<vmem>>, %arg10: memref<1x32xf32, #tpu.memory_space<vmem>>, %arg11: memref<32x64xf32, #tpu.memory_space<vmem>>, %arg12: memref<1x64xf32, #tpu.memory_space<vmem>>, %arg13: memref<1x64xf32, #tpu.memory_space<vmem>>, %arg14: memref<1x4xf32, #tpu.memory_space<vmem>>, %arg15: memref<1x16xf32, #tpu.memory_space<vmem>>) attributes {dimension_semantics = [#tpu.dimension_semantics<parallel>], iteration_bounds = array<i64: 1>, scalar_prefetch = 0 : i64, scratch_operands = 0 : i64, tpu.core_type = #tpu.core_type<tc>, window_params = [{transform_indices = @transform_0, window_bounds = array<i64: 16, 5>}, {transform_indices = @transform_1, window_bounds = array<i64: 16, 32>}, {transform_indices = @transform_2, window_bounds = array<i64: 16, 32>}, {pipeline_mode = #tpu.pipeline_mode<synchronous>, transform_indices = @transform_3, window_bounds = array<i64: 16, 32>}, {pipeline_mode = #tpu.pipeline_mode<synchronous>, transform_indices = @transform_4, window_bounds = array<i64: 16, 32>}, {pipeline_mode = #tpu.pipeline_mode<synchronous>, transform_indices = @transform_5, window_bounds = array<i64: 4, 32>}, {pipeline_mode = #tpu.pipeline_mode<synchronous>, transform_indices = @transform_6, window_bounds = array<i64: 1, 32>}, {pipeline_mode = #tpu.pipeline_mode<synchronous>, transform_indices = @transform_7, window_bounds = array<i64: 1, 32>}, {pipeline_mode = #tpu.pipeline_mode<synchronous>, transform_indices = @transform_8, window_bounds = array<i64: 1, 32>}, {pipeline_mode = #tpu.pipeline_mode<synchronous>, transform_indices = @transform_9, window_bounds = array<i64: 1, 32>}, {pipeline_mode = #tpu.pipeline_mode<synchronous>, transform_indices = @transform_10, window_bounds = array<i64: 32, 64>}, {pipeline_mode = #tpu.pipeline_mode<synchronous>, transform_indices = @transform_11, window_bounds = array<i64: 1, 64>}, {pipeline_mode = #tpu.pipeline_mode<synchronous>, transform_indices = @transform_12, window_bounds = array<i64: 1, 64>}, {pipeline_mode = #tpu.pipeline_mode<synchronous>, transform_indices = @transform_13, window_bounds = array<i64: 1, 4>}, {transform_indices = @transform_14, window_bounds = array<i64: 1, 16>}]} {
    %c0 = arith.constant 0 : index
    %c0_0 = arith.constant 0 : index
    %0 = vector.load %arg6[%c0, %c0_0] : memref<4x32xf32, #tpu.memory_space<vmem>>, vector<4x32xf32>
    %1 = arith.truncf %0 : vector<4x32xf32> to vector<4x32xbf16>
    %c0_1 = arith.constant 0 : index
    %c0_2 = arith.constant 0 : index
    %2 = vector.load %arg2[%c0_1, %c0_2] : memref<16x32xf32, #tpu.memory_space<vmem>>, vector<16x32xf32>
    %3 = arith.truncf %2 : vector<16x32xf32> to vector<16x32xbf16>
    %c0_3 = arith.constant 0 : index
    %c0_4 = arith.constant 0 : index
    %4 = vector.load %arg3[%c0_3, %c0_4] : memref<16x32xf32, #tpu.memory_space<vmem>>, vector<16x32xf32>
    %5 = arith.truncf %4 : vector<16x32xf32> to vector<16x32xbf16>
    %c0_5 = arith.constant 0 : index
    %c0_6 = arith.constant 0 : index
    %6 = vector.load %arg4[%c0_5, %c0_6] : memref<16x32xf32, #tpu.memory_space<vmem>>, vector<16x32xf32>
    %7 = arith.truncf %6 : vector<16x32xf32> to vector<16x32xbf16>
    %c0_7 = arith.constant 0 : index
    %c0_8 = arith.constant 0 : index
    %8 = vector.load %arg5[%c0_7, %c0_8] : memref<16x32xf32, #tpu.memory_space<vmem>>, vector<16x32xf32>
    %9 = arith.truncf %8 : vector<16x32xf32> to vector<16x32xbf16>
    %cst = arith.constant dense<0.000000e+00> : vector<16x4xf32>
    %10 = tpu.matmul %3, %1, %cst {dimension_numbers = #tpu.dot_dimension_numbers<[1], [1], [0], [0], [0, 0, 1, 0], [], []>} : vector<16x32xbf16>, vector<4x32xbf16>, vector<16x4xf32> -> vector<16x4xf32>
    %cst_9 = arith.constant dense<0.000000e+00> : vector<16x4xf32>
    %11 = tpu.matmul %5, %1, %cst_9 {dimension_numbers = #tpu.dot_dimension_numbers<[1], [1], [0], [0], [0, 0, 1, 0], [], []>} : vector<16x32xbf16>, vector<4x32xbf16>, vector<16x4xf32> -> vector<16x4xf32>
    %12 = vector.extract_strided_slice %10 {offsets = [0, 0], sizes = [16, 1], strides = [1, 1]} : vector<16x4xf32> to vector<16x1xf32>
    %13 = vector.extract_strided_slice %11 {offsets = [0, 1], sizes = [16, 1], strides = [1, 1]} : vector<16x4xf32> to vector<16x1xf32>
    %14 = arith.addf %12, %13 : vector<16x1xf32>
    %cst_10 = arith.constant dense<0.000000e+00> : vector<4x16xf32>
    %15 = tpu.matmul %1, %7, %cst_10 {dimension_numbers = #tpu.dot_dimension_numbers<[1], [1], [0], [0], [0, 0, 1, 0], [], []>} : vector<4x32xbf16>, vector<16x32xbf16>, vector<4x16xf32> -> vector<4x16xf32>
    %cst_11 = arith.constant dense<0.000000e+00> : vector<4x16xf32>
    %16 = tpu.matmul %1, %9, %cst_11 {dimension_numbers = #tpu.dot_dimension_numbers<[1], [1], [0], [0], [0, 0, 1, 0], [], []>} : vector<4x32xbf16>, vector<16x32xbf16>, vector<4x16xf32> -> vector<4x16xf32>
    %17 = vector.extract_strided_slice %15 {offsets = [2, 0], sizes = [1, 16], strides = [1, 1]} : vector<4x16xf32> to vector<1x16xf32>
    %18 = vector.extract_strided_slice %16 {offsets = [3, 0], sizes = [1, 16], strides = [1, 1]} : vector<4x16xf32> to vector<1x16xf32>
    %19 = arith.addf %17, %18 : vector<1x16xf32>
    %20 = vector.broadcast %14 : vector<16x1xf32> to vector<16x16xf32>
    %21 = vector.broadcast %19 : vector<1x16xf32> to vector<16x16xf32>
    %22 = arith.addf %20, %21 : vector<16x16xf32>
    %cst_12 = arith.constant 0.000000e+00 : f32
    %23 = vector.broadcast %cst_12 : f32 to vector<16x16xf32>
    %24 = arith.cmpf oge, %22, %23 : vector<16x16xf32>
    %cst_13 = arith.constant 2.000000e-01 : f32
    %25 = vector.broadcast %cst_13 : f32 to vector<16x16xf32>
    %26 = arith.mulf %25, %22 : vector<16x16xf32>
    %27 = arith.select %24, %22, %26 : vector<16x16xi1>, vector<16x16xf32>
    %c0_14 = arith.constant 0 : index
    %c0_15 = arith.constant 0 : index
    %28 = vector.load %arg1[%c0_14, %c0_15] : memref<16x5xi32, #tpu.memory_space<vmem>>, vector<16x5xi32>
    %29 = tpu.iota {dimensions = array<i32: 1>} : vector<16x16xi32>
    %30 = vector.extract_strided_slice %28 {offsets = [0, 0], sizes = [16, 1], strides = [1, 1]} : vector<16x5xi32> to vector<16x1xi32>
    %31 = vector.broadcast %30 : vector<16x1xi32> to vector<16x16xi32>
    %32 = arith.cmpi eq, %29, %31 : vector<16x16xi32>
    %33 = vector.extract_strided_slice %28 {offsets = [0, 1], sizes = [16, 1], strides = [1, 1]} : vector<16x5xi32> to vector<16x1xi32>
    %34 = vector.broadcast %33 : vector<16x1xi32> to vector<16x16xi32>
    %35 = arith.cmpi eq, %29, %34 : vector<16x16xi32>
    %36 = arith.ori %32, %35 : vector<16x16xi1>
    %37 = vector.extract_strided_slice %28 {offsets = [0, 2], sizes = [16, 1], strides = [1, 1]} : vector<16x5xi32> to vector<16x1xi32>
    %38 = vector.broadcast %37 : vector<16x1xi32> to vector<16x16xi32>
    %39 = arith.cmpi eq, %29, %38 : vector<16x16xi32>
    %40 = arith.ori %36, %39 : vector<16x16xi1>
    %41 = vector.extract_strided_slice %28 {offsets = [0, 3], sizes = [16, 1], strides = [1, 1]} : vector<16x5xi32> to vector<16x1xi32>
    %42 = vector.broadcast %41 : vector<16x1xi32> to vector<16x16xi32>
    %43 = arith.cmpi eq, %29, %42 : vector<16x16xi32>
    %44 = arith.ori %40, %43 : vector<16x16xi1>
    %45 = vector.extract_strided_slice %28 {offsets = [0, 4], sizes = [16, 1], strides = [1, 1]} : vector<16x5xi32> to vector<16x1xi32>
    %46 = vector.broadcast %45 : vector<16x1xi32> to vector<16x16xi32>
    %47 = arith.cmpi eq, %29, %46 : vector<16x16xi32>
    %48 = arith.ori %44, %47 : vector<16x16xi1>
    %cst_16 = arith.constant -1.000000e+30 : f32
    %49 = vector.broadcast %cst_16 : f32 to vector<16x16xf32>
    %50 = arith.select %48, %27, %49 : vector<16x16xi1>, vector<16x16xf32>
    %cst_17 = arith.constant dense<0xFF800000> : vector<16xf32>
    %51 = vector.multi_reduction <maximumf>, %50, %cst_17 [1] : vector<16x16xf32> to vector<16xf32>
    %52 = vector.shape_cast %51 : vector<16xf32> to vector<16x1xf32>
    %53 = vector.broadcast %52 : vector<16x1xf32> to vector<16x16xf32>
    %54 = arith.subf %50, %53 : vector<16x16xf32>
    %55 = math.exp %54 : vector<16x16xf32>
    %cst_18 = arith.constant dense<0.000000e+00> : vector<16xf32>
    %56 = vector.multi_reduction <add>, %55, %cst_18 [1] : vector<16x16xf32> to vector<16xf32>
    %57 = vector.shape_cast %56 : vector<16xf32> to vector<16x1xf32>
    %58 = arith.truncf %55 : vector<16x16xf32> to vector<16x16xbf16>
    %cst_19 = arith.constant dense<0.000000e+00> : vector<16x32xf32>
    %59 = tpu.matmul %58, %7, %cst_19 {dimension_numbers = #tpu.dot_dimension_numbers<[1], [0], [0], [1], [0, 0, 1, 1], [], []>} : vector<16x16xbf16>, vector<16x32xbf16>, vector<16x32xf32> -> vector<16x32xf32>
    %60 = tpu.reciprocal %57 {approx = true} : vector<16x1xf32> -> vector<16x1xf32>
    %61 = vector.broadcast %60 : vector<16x1xf32> to vector<16x32xf32>
    %62 = arith.mulf %59, %61 : vector<16x32xf32>
    %c0_20 = arith.constant 0 : index
    %c0_21 = arith.constant 0 : index
    %63 = vector.load %arg7[%c0_20, %c0_21] : memref<1x32xf32, #tpu.memory_space<vmem>>, vector<1x32xf32>
    %64 = vector.broadcast %63 : vector<1x32xf32> to vector<16x32xf32>
    %65 = arith.mulf %62, %64 : vector<16x32xf32>
    %c0_22 = arith.constant 0 : index
    %c0_23 = arith.constant 0 : index
    %66 = vector.load %arg8[%c0_22, %c0_23] : memref<1x32xf32, #tpu.memory_space<vmem>>, vector<1x32xf32>
    %67 = vector.broadcast %66 : vector<1x32xf32> to vector<16x32xf32>
    %68 = arith.addf %65, %67 : vector<16x32xf32>
    %cst_24 = arith.constant 0.000000e+00 : f32
    %69 = vector.broadcast %cst_24 : f32 to vector<16x32xf32>
    %70 = arith.maximumf %68, %69 : vector<16x32xf32>
    %71 = arith.mulf %70, %4 : vector<16x32xf32>
    %c0_25 = arith.constant 0 : index
    %c0_26 = arith.constant 0 : index
    %72 = vector.load %arg9[%c0_25, %c0_26] : memref<1x32xf32, #tpu.memory_space<vmem>>, vector<1x32xf32>
    %73 = vector.broadcast %72 : vector<1x32xf32> to vector<16x32xf32>
    %74 = arith.mulf %71, %73 : vector<16x32xf32>
    %c0_27 = arith.constant 0 : index
    %c0_28 = arith.constant 0 : index
    %75 = vector.load %arg10[%c0_27, %c0_28] : memref<1x32xf32, #tpu.memory_space<vmem>>, vector<1x32xf32>
    %76 = vector.broadcast %75 : vector<1x32xf32> to vector<16x32xf32>
    %77 = arith.addf %74, %76 : vector<16x32xf32>
    %cst_29 = arith.constant 0.000000e+00 : f32
    %78 = vector.broadcast %cst_29 : f32 to vector<16x32xf32>
    %79 = arith.maximumf %77, %78 : vector<16x32xf32>
    %80 = arith.truncf %79 : vector<16x32xf32> to vector<16x32xbf16>
    %c0_30 = arith.constant 0 : index
    %c0_31 = arith.constant 0 : index
    %81 = vector.load %arg11[%c0_30, %c0_31] : memref<32x64xf32, #tpu.memory_space<vmem>>, vector<32x64xf32>
    %82 = arith.truncf %81 : vector<32x64xf32> to vector<32x64xbf16>
    %cst_32 = arith.constant dense<0.000000e+00> : vector<16x64xf32>
    %83 = tpu.matmul %80, %82, %cst_32 {dimension_numbers = #tpu.dot_dimension_numbers<[1], [0], [0], [1], [0, 0, 1, 1], [], []>} : vector<16x32xbf16>, vector<32x64xbf16>, vector<16x64xf32> -> vector<16x64xf32>
    %c0_33 = arith.constant 0 : index
    %c0_34 = arith.constant 0 : index
    %84 = vector.load %arg12[%c0_33, %c0_34] : memref<1x64xf32, #tpu.memory_space<vmem>>, vector<1x64xf32>
    %85 = vector.broadcast %84 : vector<1x64xf32> to vector<16x64xf32>
    %86 = arith.addf %83, %85 : vector<16x64xf32>
    %c0_35 = arith.constant 0 : index
    %c0_36 = arith.constant 0 : index
    %87 = vector.load %arg13[%c0_35, %c0_36] : memref<1x64xf32, #tpu.memory_space<vmem>>, vector<1x64xf32>
    %88 = arith.truncf %87 : vector<1x64xf32> to vector<1x64xbf16>
    %89 = arith.truncf %86 : vector<16x64xf32> to vector<16x64xbf16>
    %cst_37 = arith.constant dense<0.000000e+00> : vector<1x16xf32>
    %90 = tpu.matmul %88, %89, %cst_37 {dimension_numbers = #tpu.dot_dimension_numbers<[1], [1], [0], [0], [0, 0, 1, 0], [], []>} : vector<1x64xbf16>, vector<16x64xbf16>, vector<1x16xf32> -> vector<1x16xf32>
    %c0_38 = arith.constant 0 : index
    %c0_39 = arith.constant 0 : index
    %91 = vector.load %arg14[%c0_38, %c0_39] : memref<1x4xf32, #tpu.memory_space<vmem>>, vector<1x4xf32>
    %92 = vector.extract_strided_slice %91 {offsets = [0, 0], sizes = [1, 1], strides = [1, 1]} : vector<1x4xf32> to vector<1x1xf32>
    %93 = vector.broadcast %92 : vector<1x1xf32> to vector<1x16xf32>
    %94 = arith.addf %90, %93 : vector<1x16xf32>
    %95 = vector.extract_strided_slice %91 {offsets = [0, 1], sizes = [1, 1], strides = [1, 1]} : vector<1x4xf32> to vector<1x1xf32>
    %96 = vector.broadcast %95 : vector<1x1xf32> to vector<1x16xf32>
    %97 = arith.mulf %94, %96 : vector<1x16xf32>
    %98 = vector.extract_strided_slice %91 {offsets = [0, 2], sizes = [1, 1], strides = [1, 1]} : vector<1x4xf32> to vector<1x1xf32>
    %99 = vector.broadcast %98 : vector<1x1xf32> to vector<1x16xf32>
    %100 = arith.addf %97, %99 : vector<1x16xf32>
    %cst_40 = arith.constant 0.000000e+00 : f32
    %101 = vector.broadcast %cst_40 : f32 to vector<1x16xf32>
    %102 = arith.maximumf %100, %101 : vector<1x16xf32>
    %c0_41 = arith.constant 0 : index
    %c0_42 = arith.constant 0 : index
    %103 = vector.load %arg15[%c0_41, %c0_42] : memref<1x16xf32, #tpu.memory_space<vmem>>, vector<1x16xf32>
    tpu.vector_store %arg15[%c0_41, %c0_42], %102 {strides = array<i32>} : memref<1x16xf32, #tpu.memory_space<vmem>>, vector<1x16xf32>,
    return
  }
  func.func @transform_0(%arg0: i32) -> (i32, i32) {
    %c0_i32 = arith.constant 0 : i32
    %c0_i32_0 = arith.constant 0 : i32
    return %arg0, %c0_i32 : i32, i32
  }
  func.func @transform_1(%arg0: i32) -> (i32, i32) {
    %c0_i32 = arith.constant 0 : i32
    %c0_i32_0 = arith.constant 0 : i32
    return %arg0, %c0_i32 : i32, i32
  }
  func.func @transform_2(%arg0: i32) -> (i32, i32) {
    %c0_i32 = arith.constant 0 : i32
    %c0_i32_0 = arith.constant 0 : i32
    return %arg0, %c0_i32 : i32, i32
  }
  func.func @transform_3(%arg0: i32) -> (i32, i32) {
    %c0_i32 = arith.constant 0 : i32
    %c0_i32_0 = arith.constant 0 : i32
    %c0_i32_1 = arith.constant 0 : i32
    return %c0_i32, %c0_i32_0 : i32, i32
  }
  func.func @transform_4(%arg0: i32) -> (i32, i32) {
    %c0_i32 = arith.constant 0 : i32
    %c0_i32_0 = arith.constant 0 : i32
    %c0_i32_1 = arith.constant 0 : i32
    return %c0_i32, %c0_i32_0 : i32, i32
  }
  func.func @transform_5(%arg0: i32) -> (i32, i32) {
    %c0_i32 = arith.constant 0 : i32
    %c0_i32_0 = arith.constant 0 : i32
    %c0_i32_1 = arith.constant 0 : i32
    return %c0_i32, %c0_i32_0 : i32, i32
  }
  func.func @transform_6(%arg0: i32) -> (i32, i32) {
    %c0_i32 = arith.constant 0 : i32
    %c0_i32_0 = arith.constant 0 : i32
    %c0_i32_1 = arith.constant 0 : i32
    return %c0_i32, %c0_i32_0 : i32, i32
  }
  func.func @transform_7(%arg0: i32) -> (i32, i32) {
    %c0_i32 = arith.constant 0 : i32
    %c0_i32_0 = arith.constant 0 : i32
    %c0_i32_1 = arith.constant 0 : i32
    return %c0_i32, %c0_i32_0 : i32, i32
  }
  func.func @transform_8(%arg0: i32) -> (i32, i32) {
    %c0_i32 = arith.constant 0 : i32
    %c0_i32_0 = arith.constant 0 : i32
    %c0_i32_1 = arith.constant 0 : i32
    return %c0_i32, %c0_i32_0 : i32, i32
  }
  func.func @transform_9(%arg0: i32) -> (i32, i32) {
    %c0_i32 = arith.constant 0 : i32
    %c0_i32_0 = arith.constant 0 : i32
    %c0_i32_1 = arith.constant 0 : i32
    return %c0_i32, %c0_i32_0 : i32, i32
  }
  func.func @transform_10(%arg0: i32) -> (i32, i32) {
    %c0_i32 = arith.constant 0 : i32
    %c0_i32_0 = arith.constant 0 : i32
    %c0_i32_1 = arith.constant 0 : i32
    return %c0_i32, %c0_i32_0 : i32, i32
  }
  func.func @transform_11(%arg0: i32) -> (i32, i32) {
    %c0_i32 = arith.constant 0 : i32
    %c0_i32_0 = arith.constant 0 : i32
    %c0_i32_1 = arith.constant 0 : i32
    return %c0_i32, %c0_i32_0 : i32, i32
  }
  func.func @transform_12(%arg0: i32) -> (i32, i32) {
    %c0_i32 = arith.constant 0 : i32
    %c0_i32_0 = arith.constant 0 : i32
    %c0_i32_1 = arith.constant 0 : i32
    return %c0_i32, %c0_i32_0 : i32, i32
  }
  func.func @transform_13(%arg0: i32) -> (i32, i32) {
    %c0_i32 = arith.constant 0 : i32
    %c0_i32_0 = arith.constant 0 : i32
    %c0_i32_1 = arith.constant 0 : i32
    return %c0_i32, %c0_i32_0 : i32, i32
  }
  func.func @transform_14(%arg0: i32) -> (i32, i32) {
    %c0_i32 = arith.constant 0 : i32
    %c0_i32_0 = arith.constant 0 : i32
    return %c0_i32, %arg0 : i32, i32
  }
}

</mosaic_0001>

<bundles_post_ra>
// kernel: squeeze.1
= control target key start
LH: loop header
LB: loop body
LE: loop exit
PB: predicated region body
PF: predicated region fallthrough
CT: control target
= control target key end

     0   :  { %s80_s0 = inlined_call_operand.vmem [shape: f32[16], index: 0, kind: input, shape index: {}]   ;;  %s81_s1 = inlined_call_operand.hbm [shape: f32[2,1,8], index: 1, kind: output, shape index: {}]  }
   0x1   :  { %v5_v0 = vld [vmem:[%s80_s0] sm:$0x1] }
   0x2   :  { %2 = vsyncpa [#allocation1], 0  ;;  %6 = vst [vmem:[#allocation3] sm:$0x1] %v5_v0  ;;  %vm8_vm0 = vcmask 64512   ;;  %s62_s0 = smov 120  }
   0x3   :  { %s63_s8 = smov [#allocation0]   ;;  %s27_s1 = sshll.u32 %s81_s1, 4  ;;  %s28_s1 = int_to_ptr.hbm [resolvable:$true] %s27_s1 }
   0x4   :  { %s25_s9 = sshll.u32 %s63_s8, 4  ;;  %s26_s9 = int_to_ptr.vmem [resolvable:$true] %s25_s9 }
   0x9   :  { %v10_v1 = vld [vmem:[#allocation3] sm:$0x1]  }
   0xa   :  { %v7_v2 = vld [vmem:[#allocation3] sm:$0x1]   ;;  %11 = vrot.lane.b32.xlu0 %v10_v1, %s62_s0 }
   0xb   :  { %9 = vst.msk [vmem:[#allocation2] sm:$0x1] %vm8_vm0, %v7_v2  }
  0x7c   :  { %v12_v3 = vpop.permute.xlu0 %11  }
  0x7d   :  { %15 = vst.msk [vmem:[#allocation2 + $0x1] sm:$0x1] %vm8_vm0, %v12_v3  }
  0x84   :  { %v18_v4 = vld [vmem:[#allocation2] sm:$0x3] }
  0x85   :  { %21 = vst [vmem:[#allocation0] sm:$0x3] %v18_v4 }
  0x86   :  { %30 = dma.vmem_to_hbm [thread:$0]  %s26_s9, 32, %s28_s1, [#allocation1]  }
  0x87   :  { %60 = dma.done.wait [#allocation1], 32  }
  0x88   :  { %61 = vsyncadd [#allocation1], 4294967264 }
  0x89   :  { %33 = vsyncpa [#allocation1], 1 }

// kernel: gdn_forward.2
= control target key start
LH: loop header
LB: loop body
LE: loop exit
PB: predicated region body
PF: predicated region fallthrough
CT: control target
= control target key end

     0   :  { %7 = vsyncpa [#allocation3], 0  ;;  %s90_s12 = smov [#allocation2]   ;;  %s91_s14 = smov 128   ;;  %s123_s0 = inlined_call_operand.vmem [shape: f32[16,16], index: 0, kind: input, shape index: {}]   ;;  %s124_s1 = inlined_call_operand.hbm [shape: f32[16,32], index: 1, kind: input, shape index: {}]   ;;  %s125_s2 = inlined_call_operand.vmem [shape: f32[16,32], index: 2, kind: output, shape index: {}]  }
   0x1   :  { %s14_s11 = sshll.u32 %s124_s1, 4  ;;  %s16_s13 = sshll.u32 %s90_s12, 4  ;;  %s15_s11 = int_to_ptr.hbm [resolvable:$true] %s14_s11  ;;  %s17_s13 = int_to_ptr.vmem [resolvable:$true] %s16_s13 }
   0x2   :  { %s92_s15 = smov 8  }
   0x3   :  { %22 = dma.hbm_to_vmem [thread:$0]  %s15_s11, 256, %s17_s13, [#allocation3], %s91_s14, %s91_s14, %s92_s15  }
   0x4   :  { %88 = dma.done.wait [#allocation3], 256  }
   0x5   :  { %89 = vsyncadd [#allocation3], 4294967040  ;;  %v31_v0 = vld [vmem:[#allocation2] sm:$0xff]  ;;  %v32_v1 = vld [vmem:[#allocation2 + $0x8] sm:$0xff]  ;;  %vm34_vm0 = vcmask 130048   ;;  %vm52_vm1 = vcmask 261120  }
   0x6   :  { %v28_v2 = vld [vmem:[%s123_s0] sm:$0xff]  ;;  %v33_v3 = vpack.c.bf16 %v32_v1, %v31_v0  ;;  %v29_v4 = vld [vmem:[%s123_s0 + $0x8] sm:$0xff] }
   0x7   :  { %v30_v5 = vpack.c.bf16 %v29_v4, %v28_v2 }
   0x8   :  { %45 = vmatpush.bf16.msra.mxu0 %v33_v3 }
   0xb   :  { %60 = vmatmul.msk.bf16.vlgmr.msra.gmra.mxu0 %vm34_vm0, %v30_v5 }
  0x88   :  { %v47_v6 = vpop.f32.mrf.mxu0 }
  0x89   :  { %53 = vst.msk [vmem:[%s125_s2] sm:$0xff] %vm52_vm1, %v47_v6 }
  0x90   :  { %v49_v7 = vpop.f32.mrf.mxu0 }
  0x91   :  { %54 = vst.msk [vmem:[%s125_s2 + $0x8] sm:$0xff] %vm52_vm1, %v49_v7 }
  0x92   :  { %59 = vsyncpa [#allocation3], 1 }

// kernel: gdn_forward.3
= control target key start
LH: loop header
LB: loop body
LE: loop exit
PB: predicated region body
PF: predicated region fallthrough
CT: control target
= control target key end

     0   :  { %19 = vsyncpa [#allocation3], 0  ;;  %s663_s0 = inlined_call_operand.vmem [shape: s32[16,5], index: 0, kind: input, shape index: {}]   ;;  %s664_s1 = inlined_call_operand.vmem [shape: f32[16,32], index: 1, kind: input, shape index: {}, may-alias: {1,3}]   ;;  %s665_s2 = inlined_call_operand.vmem [shape: f32[16,32], index: 2, kind: input, shape index: {}, may-alias: {2,4}]   ;;  %s666_s3 = inlined_call_operand.vmem [shape: f32[16,32], index: 3, kind: input, shape index: {}, may-alias: {1,3}]   ;;  %s667_s4 = inlined_call_operand.vmem [shape: f32[16,32], index: 4, kind: input, shape index: {}, may-alias: {2,4}]   ;;  %s668_s5 = inlined_call_operand.vmem [shape: f32[4,32], index: 5, kind: input, shape index: {}]   ;;  %s669_s6 = inlined_call_operand.vmem [shape: f32[1,32], index: 6, kind: input, shape index: {}]   ;;  %s670_s7 = inlined_call_operand.vmem [shape: f32[1,32], index: 7, kind: input, shape index: {}]   ;;  %s671_s8 = inlined_call_operand.vmem [shape: f32[1,32], index: 8, kind: input, shape index: {}]   ;;  %s672_s9 = inlined_call_operand.vmem [shape: f32[1,32], index: 9, kind: input, shape index: {}]   ;;  %s673_s10 = inlined_call_operand.vmem [shape: f32[32,64], index: 10, kind: input, shape index: {}]   ;;  %s674_s11 = inlined_call_operand.hbm [shape: f32[1,64], index: 11, kind: input, shape index: {}]   ;;  %s675_s12 = inlined_call_operand.hbm [shape: f32[1,64], index: 12, kind: input, shape index: {}]   ;;  %s676_s13 = inlined_call_operand.vmem [shape: f32[1,4], index: 13, kind: input, shape index: {}]   ;;  %s677_s14 = inlined_call_operand.vmem [shape: f32[1,16], index: 14, kind: output, shape index: {}]  }
   0x1   :  { %s48_s15 = sshll.u32 %s674_s11, 4  ;;  %s49_s15 = int_to_ptr.hbm [resolvable:$true] %s48_s15 }
   0x2   :  { %20 = vsyncpa [#allocation5], 0  ;;  %s490_s16 = smov [#allocation2]   ;;  %s59_s20 = sshll.u32 %s675_s12, 4  ;;  %s60_s20 = int_to_ptr.hbm [resolvable:$true] %s59_s20 }
   0x3   :  { %s50_s17 = sshll.u32 %s490_s16, 4  ;;  %s491_s21 = smov [#allocation4]   ;;  %s51_s17 = int_to_ptr.vmem [resolvable:$true] %s50_s17 }
   0x4   :  { %53 = dma.hbm_to_vmem [thread:$0]  %s49_s15, 16, %s51_s17, [#allocation3]  }
   0x5   :  { %s61_s22 = sshll.u32 %s491_s21, 4  ;;  %s62_s22 = int_to_ptr.vmem [resolvable:$true] %s61_s22 }
   0x6   :  { %64 = dma.hbm_to_vmem [thread:$0]  %s60_s20, 16, %s62_s22, [#allocation5]  }
   0x7   :  { %486 = dma.done.wait [#allocation3], 16  }
   0x8   :  { %487 = vsyncadd [#allocation3], 4294967280 }
   0x9   :  { %488 = dma.done.wait [#allocation5], 16  }
   0xa   :  { %489 = vsyncadd [#allocation5], 4294967280  ;;  %v76_v0 = vld [vmem:[%s668_s5] sm:$0xf]  ;;  %vm90_vm0 = vcmask 261120   ;;  %v591_v4 = vld [vmem:[%s665_s2 + $0x8] sm:$0xff]  ;;  %v195_v43 = vlaneseq }
   0xb   :  { %v77_v1 = vpack.c.bf16 %v76_v0, %v76_v0  ;;  %v586_v3 = vld [vmem:[%s665_s2] sm:$0xff]  ;;  %v79_v6 = vld [vmem:[%s664_s1 + $0x8] sm:$0xff]  ;;  %v492_v14 = vmov 1   ;;  %v493_v15 = vmov 0   ;;  %v494_v21 = vmov 2  }
   0xc   :  { %v78_v5 = vld [vmem:[%s664_s1] sm:$0xff]  ;;  %v83_v7 = vpack.c.bf16 %v591_v4, %v586_v3  ;;  %v88_v10 = vld [vmem:[%s667_s4 + $0x8] sm:$0xff]  ;;  %414 = vset.pattern.permute.xlu1 %v492_v14  ;;  %412 = vset.pattern.permute.xlu2 %v493_v15  ;;  %v496_v23 = vmov 3   ;;  %v497_v25 = vmov 4   ;;  %v196_v45 = vand.u32 127, %v195_v43 }
   0xd   :  { %v95_v2 = vsel %vm90_vm0, %v77_v1, 0  ;;  %v80_v8 = vpack.c.bf16 %v79_v6, %v78_v5  ;;  %v87_v9 = vld [vmem:[%s667_s4] sm:$0xff]  ;;  %v85_v13 = vld [vmem:[%s666_s3 + $0x8] sm:$0xff]  ;;  %413 = vset.pattern.permute.xlu0 %v492_v14  ;;  %vm247_vm14 = vcmask 130048  }
   0xe   :  { %121 = vmatpush.bf16.xpose.msra.mxu1 %v95_v2  ;;  %104 = vmatpush.bf16.xpose.msra.mxu0 %v95_v2  ;;  %v84_v11 = vld [vmem:[%s666_s3] sm:$0xff]  ;;  %v89_v12 = vpack.c.bf16 %v88_v10, %v87_v9  ;;  %v194_v16 = vld [vmem:[%s663_s0 + $0x8] sm:$0xff] }
   0xf   :  { %v193_v17 = vld [vmem:[%s663_s0] sm:$0xff]  ;;  %v86_v18 = vpack.c.bf16 %v85_v13, %v84_v11  ;;  %209 = vperm.xlu1 %414, %v194_v16   ;;  %s495_s0 = smov 127   ;;  %v322_v13 = vld [vmem:[%s673_s10 + $0x18] sm:$0xff] }
  0x10   :  { %v155_v19 = vsel %vm90_vm0, %v89_v12, 0  ;;  %198 = vperm.xlu2 %412, %v193_v17   ;;  %v321_v12 = vld [vmem:[%s673_s10 + $0x10] sm:$0xff] }
  0x11   :  { %164 = vmatpush.bf16.xpose.msra.mxu3 %v155_v19  ;;  %v139_v20 = vsel %vm90_vm0, %v86_v18, 0 }
  0x12   :  { %148 = vmatpush.bf16.xpose.msra.mxu2 %v139_v20  ;;  %v425_v20 = vld [vmem:[%s669_s6] ss:$0 sm:$0xff] }
  0x15   :  { %398 = vmatmul.msk.bf16.vlgmr.msra.gmra.mxu1 %vm90_vm0, %v83_v7  ;;  %397 = vmatmul.msk.bf16.vlgmr.msra.gmra.mxu0 %vm90_vm0, %v80_v8 }
  0x16   :  { %277 = vmatpush.bf16.msrb.mxu0 %v86_v18 }
  0x17   :  { %416 = vset.pattern.permute.xlu1 %v494_v21 }
  0x18   :  { %400 = vmatmul.msk.bf16.vlgmr.msra.gmra.mxu3 %vm90_vm0, %v77_v1  ;;  %201 = vperm.xlu2 %412, %v194_v16  }
  0x19   :  { %399 = vmatmul.msk.bf16.vlgmr.msra.gmra.mxu2 %vm90_vm0, %v77_v1  ;;  %219 = vperm.xlu1 %416, %v194_v16  }
  0x20   :  { %415 = vset.pattern.permute.xlu2 %v494_v21 }
  0x21   :  { %216 = vperm.xlu2 %415, %v193_v17   ;;  %419 = vset.pattern.permute.xlu1 %v493_v15 }
  0x29   :  { %417 = vset.pattern.permute.xlu2 %v496_v23 }
  0x2a   :  { %226 = vperm.xlu2 %417, %v193_v17  }
  0x32   :  { %421 = vset.pattern.permute.xlu2 %v497_v25 }
  0x33   :  { %239 = vperm.xlu2 %421, %v194_v16  }
  0x3b   :  { %423 = vset.pattern.permute.xlu2 %v492_v14  ;;  %v324_v14 = vpack.c.bf16 %v322_v13, %v321_v12 }
  0x3d   :  { %338 = vmatpush.bf16.msrb.mxu1 %v324_v14 }
  0x6a   :  { %v199_v38 = vpop.permute.xlu2 %198 }
  0x6b   :  { %vm203_vm7 = vcmp.eq.s32.totalorder %v196_v45, %v199_v38 }
  0x72   :  { %v202_v39 = vpop.permute.xlu2 %201 }
  0x73   :  { %vm204_vm1 = vcmp.eq.s32.totalorder %v196_v45, %v202_v39 }
  0x7b   :  { %v217_v41 = vpop.permute.xlu2 %216 }
  0x7c   :  { %vm221_vm12 = vcmp.eq.s32.totalorder %v196_v45, %v217_v41 }
  0x81   :  { %v210_v40 = vpop.permute.xlu1 %209 }
  0x82   :  { %vm212_vm2 = vcmp.eq.s32.totalorder %v196_v45, %v210_v40 }
  0x83   :  { %vm214_vm3 = vmor %vm204_vm1, %vm212_vm2 }
  0x84   :  { %v227_v46 = vpop.permute.xlu2 %226 }
  0x85   :  { %vm231_vm2 = vcmp.eq.s32.totalorder %v196_v45, %v227_v46  ;;  %v429_v46 = vld [vmem:[#allocation2] ss:$0 sm:$0xff] }
  0x8b   :  { %v220_v42 = vpop.permute.xlu1 %219 }
  0x8c   :  { %vm222_vm4 = vcmp.eq.s32.totalorder %v196_v45, %v220_v42 }
  0x8d   :  { %vm224_vm5 = vmor %vm214_vm3, %vm222_vm4  ;;  %v240_v49 = vpop.permute.xlu2 %239 }
  0x8e   :  { %vm242_vm10 = vcmp.eq.s32.totalorder %v196_v45, %v240_v49 }
  0x92   :  { %v123_v22 = vpop.f32.mrf.mxu1  ;;  %v106_v26 = vpop.f32.mrf.mxu0 }
  0x93   :  { %130 = vrot.lane.b32.xlu0 %v123_v22, %s495_s0 }
  0x9a   :  { %v125_v24 = vpop.f32.mrf.mxu1  ;;  %v108_v29 = vpop.f32.mrf.mxu0 }
  0x9b   :  { %132 = vrot.lane.b32.xlu0 %v125_v24, %s495_s0  ;;  %v166_v32 = vpop.f32.mrf.mxu3  ;;  %v426_v24 = vld [vmem:[%s670_s7] ss:$0 sm:$0xff] }
  0x9c   :  { %v150_v33 = vpop.f32.mrf.mxu2  ;;  %v171_v34 = vrot.slane %v166_v32, 1  ;;  %v427_v32 = vld [vmem:[%s671_s8] ss:$0 sm:$0xff] }
  0x9e   :  { %v173_v35 = vadd.f32 %v171_v34, %v150_v33 }
  0xa0   :  { %v184_v50 = vperm.slane %v173_v35, 2 }
  0xa3   :  { %206 = vperm.xlu0 %413, %v193_v17   ;;  %v168_v36 = vpop.f32.mrf.mxu3 }
  0xa4   :  { %v152_v37 = vpop.f32.mrf.mxu2 }
  0xa5   :  { %v428_v37 = vld [vmem:[%s672_s9] ss:$0 sm:$0xff] }
  0xab   :  { %418 = vset.pattern.permute.xlu0 %v496_v23 }
  0xac   :  { %229 = vperm.xlu0 %418, %v194_v16   ;;  %v320_v16 = vld [vmem:[%s673_s10 + $0x8] sm:$0xff] }
  0xb4   :  { %424 = vset.pattern.permute.xlu0 %v494_v21 }
 0x105   :  { %v131_v27 = vpop.permute.xlu0 %130 }
 0x106   :  { %v136_v28 = vadd.f32 %v131_v27, %v106_v26 }
 0x108   :  { %176 = vperm.xlu1 %419, %v136_v28  }
 0x10d   :  { %v133_v30 = vpop.permute.xlu0 %132 }
 0x10e   :  { %v137_v31 = vadd.f32 %v133_v30, %v108_v29 }
 0x110   :  { %181 = vperm.xlu1 %419, %v137_v31  }
 0x115   :  { %v207_v44 = vpop.permute.xlu0 %206 }
 0x116   :  { %vm211_vm8 = vcmp.eq.s32.totalorder %v196_v45, %v207_v44  ;;  %v349_v44 = vld [vmem:[%s676_s13] sm:$0x1] }
 0x117   :  { %vm213_vm13 = vmor %vm203_vm7, %vm211_vm8  ;;  %vm356_vm7 = vcmask 523264  }
 0x118   :  { %420 = vset.pattern.permute.xlu1 %v497_v25  ;;  %vm223_vm1 = vmor %vm213_vm13, %vm221_vm12 }
 0x119   :  { %236 = vperm.xlu1 %420, %v193_v17   ;;  %vm233_vm4 = vmor %vm223_vm1, %vm231_vm2 }
 0x11e   :  { %v230_v48 = vpop.permute.xlu0 %229 }
 0x11f   :  { %vm232_vm6 = vcmp.eq.s32.totalorder %v196_v45, %v230_v48 }
 0x120   :  { %vm234_vm9 = vmor %vm224_vm5, %vm232_vm6 }
 0x121   :  { %422 = vset.pattern.permute.xlu1 %v493_v15  ;;  %vm244_vm15 = vmor %vm234_vm9, %vm242_vm10  ;;  %v319_v15 = vld [vmem:[%s673_s10] sm:$0xff] }
 0x122   :  { %v323_v17 = vpack.c.bf16 %v320_v16, %v319_v15 }
 0x124   :  { %339 = vmatpush.bf16.msrb.mxu1 %v323_v17 }
 0x17a   :  { %v177_v47 = vpop.permute.xlu1 %176 }
 0x17b   :  { %v185_v53 = vadd.f32 %v184_v50, %v177_v47 }
 0x17d   :  { %v189_v57 = vmul.f32 0.2, %v185_v53  ;;  %vm187_vm3 = vcmp.ge.f32.partialorder %v185_v53, 0.0 }
 0x17f   :  { %v191_v60 = vsel %vm187_vm3, %v185_v53, %v189_v57 }
 0x182   :  { %v182_v51 = vpop.permute.xlu1 %181 }
 0x183   :  { %v186_v52 = vadd.f32 %v184_v50, %v182_v51  ;;  %v346_v51 = vld [vmem:[#allocation4] sm:$0x1] }
 0x185   :  { %v190_v54 = vmul.f32 0.2, %v186_v52  ;;  %vm188_vm11 = vcmp.ge.f32.partialorder %v186_v52, 0.0 }
 0x187   :  { %v192_v55 = vsel %vm188_vm11, %v186_v52, %v190_v54  ;;  %v347_v52 = vpack.c.bf16 %v346_v51, %v346_v51 }
 0x188   :  { %v246_v56 = vsel %vm244_vm15, %v192_v55, -1e+30 }
 0x189   :  { %v251_v58 = vsel %vm247_vm14, %v246_v56, -inf }
 0x18a   :  { %252 = vmax.xlane.f32.xlu2 %v251_v58 }
 0x18b   :  { %v237_v59 = vpop.permute.xlu1 %236 }
 0x18c   :  { %vm241_vm5 = vcmp.eq.s32.totalorder %v196_v45, %v237_v59 }
 0x18d   :  { %vm243_vm6 = vmor %vm233_vm4, %vm241_vm5 }
 0x18e   :  { %v245_v61 = vsel %vm243_vm6, %v191_v60, -1e+30 }
 0x18f   :  { %v248_v62 = vsel %vm247_vm14, %v245_v61, -inf }
 0x190   :  { %249 = vmax.xlane.f32.xlu1 %v248_v62 }
 0x1a9   :  { %352 = vperm.xlu1 %422, %v349_v44  }
 0x1fd   :  { %v253_v63 = vpop.xlane.xlu2 %252 }
 0x1fe   :  { %v255_v0 = vsub.f32 %v246_v56, %v253_v63 }
 0x200   :  { %v258_v1 = vmul.f32 1.442695, %v255_v0 }
 0x202   :  { %430 = vpow2.f32 %v258_v1 }
 0x203   :  { %v250_v2 = vpop.xlane.xlu1 %249 }
 0x204   :  { %v254_v5 = vsub.f32 %v245_v61, %v250_v2 }
 0x206   :  { %v256_v6 = vmul.f32 1.442695, %v254_v5 }
 0x208   :  { %v431_v7 = vpop.eup %430  ;;  %432 = vpow2.f32 %v256_v6 }
 0x209   :  { %v263_v8 = vsel %vm247_vm14, %v431_v7, 0.0 }
 0x20a   :  { %264 = vadd.xlane.f32.xlu2 %v263_v8 }
 0x20e   :  { %v433_v9 = vpop.eup %432 }
 0x20f   :  { %v260_v10 = vsel %vm247_vm14, %v433_v9, 0.0  ;;  %v266_v11 = vpack.c.bf16 %v431_v7, %v433_v9 }
 0x210   :  { %261 = vadd.xlane.f32.xlu0 %v260_v10 }
 0x211   :  { %401 = vmatmul.msk.bf16.vlgmr.msrb.gmra.mxu0 %vm247_vm14, %v266_v11 }
 0x21b   :  { %v353_v53 = vpop.permute.xlu1 %352 }
 0x21c   :  { %v355_v55 = vperm.slane %v353_v53, 0 }
 0x222   :  { %377 = vperm.xlu2 %423, %v349_v44  }
 0x224   :  { %383 = vperm.xlu0 %424, %v349_v44  }
 0x27d   :  { %v265_v19 = vpop.xlane.xlu2 %264 }
 0x283   :  { %v262_v18 = vpop.xlane.xlu0 %261 }
 0x284   :  { %434 = vrcp.f32 %v262_v18 }
 0x285   :  { %436 = vrcp.f32 %v265_v19  ;;  %v378_v54 = vpop.permute.xlu2 %377 }
 0x286   :  { %v380_v57 = vperm.slane %v378_v54, 0 }
 0x28a   :  { %v435_v21 = vpop.eup %434 }
 0x28b   :  { %v437_v28 = vpop.eup %436 }
 0x28e   :  { %v279_v22 = vpop.f32.mrf.mxu0 }
 0x28f   :  { %v286_v23 = vmul.f32 %v435_v21, %v279_v22 }
 0x291   :  { %v292_v25 = vmul.f32 %v425_v20, %v286_v23 }
 0x293   :  { %v298_v26 = vadd.f32 %v426_v24, %v292_v25 }
 0x295   :  { %v300_v27 = vmax.f32 %v298_v26, 0.0 }
 0x296   :  { %v281_v29 = vpop.f32.mrf.mxu0  ;;  %v384_v56 = vpop.permute.xlu0 %383 }
 0x297   :  { %v287_v30 = vmul.f32 %v437_v28, %v281_v29  ;;  %v302_v31 = vmul.f32 %v300_v27, %v586_v3  ;;  %v386_v60 = vperm.slane %v384_v56, 0 }
 0x299   :  { %v293_v33 = vmul.f32 %v425_v20, %v287_v30  ;;  %v308_v35 = vmul.f32 %v427_v32, %v302_v31 }
 0x29b   :  { %v299_v34 = vadd.f32 %v426_v24, %v293_v33  ;;  %v314_v40 = vadd.f32 %v428_v37, %v308_v35 }
 0x29d   :  { %v301_v36 = vmax.f32 %v299_v34, 0.0  ;;  %v316_v42 = vmax.f32 %v314_v40, 0.0 }
 0x29f   :  { %v303_v38 = vmul.f32 %v301_v36, %v591_v4 }
 0x2a1   :  { %v309_v39 = vmul.f32 %v427_v32, %v303_v38 }
 0x2a3   :  { %v315_v41 = vadd.f32 %v428_v37, %v309_v39 }
 0x2a5   :  { %v317_v43 = vmax.f32 %v315_v41, 0.0 }
 0x2a7   :  { %v318_v3 = vpack.c.bf16 %v317_v43, %v316_v42 }
 0x2a9   :  { %402 = vmatmul.msk.bf16.vlgmr.msrb.gmra.mxu1 %vm90_vm0, %v318_v3  ;;  %vm389_vm0 = vcmask 122880  }
 0x326   :  { %v341_v45 = vpop.f32.mrf.mxu1 }
 0x327   :  { %v342_v48 = vadd.f32 %v429_v46, %v341_v45 }
 0x32e   :  { %v343_v47 = vpop.f32.mrf.mxu1 }
 0x32f   :  { %v344_v4 = vadd.f32 %v429_v46, %v343_v47 }
 0x331   :  { %v348_v49 = vpack.c.bf16 %v344_v4, %v342_v48 }
 0x333   :  { %v361_v50 = vsel %vm356_vm7, %v348_v49, 0 }
 0x334   :  { %370 = vmatpush.bf16.xpose.msrb.mxu2 %v361_v50 }
 0x33b   :  { %403 = vmatmul.msk.bf16.vlgmr.msrb.gmra.mxu2 %vm356_vm7, %v347_v52 }
 0x3be   :  { %v372_v58 = vpop.f32.mrf.mxu2 }
 0x3bf   :  { %v373_v59 = vadd.f32 %v372_v58, %v355_v55 }
 0x3c1   :  { %v381_v61 = vmul.f32 %v380_v57, %v373_v59 }
 0x3c3   :  { %v387_v62 = vadd.f32 %v386_v60, %v381_v61 }
 0x3c5   :  { %v388_v63 = vmax.f32 %v387_v62, 0.0 }
 0x3c6   :  { %v374_v0 = vpop.f32.mrf.mxu2 }
 0x3c7   :  { %390 = vst.msk [vmem:[%s677_s14] sm:$0x1] %vm389_vm0, %v388_v63 }
 0x3c8   :  { %395 = vsyncpa [#allocation3], 1 }
 0x3c9   :  { %396 = vsyncpa [#allocation5], 1 }

</bundles_post_ra>
